<compile_context>
chip_gen: v6e
topology: v6e:2x2x1
jax: 0.10.0
libtpu: 0.0.40
codegen_flags: <defaults>
</compile_context>

<pallas_src>
import jax
import jax.numpy as jnp
from jax.experimental import pallas as pl
from jax.experimental.pallas import tpu as pltpu


def _round_up(x: int, m: int) -> int:
    return ((x + m - 1) // m) * m


def _cdiv(a: int, b: int) -> int:
    return -(-a // b)


def mlp_kernel(x_ref, w1_ref, b1_ref, w2_ref, b2_ref, o_ref):
    # x: (TB, obs)  w1: (obs, H_P)  b1: (1, H_P)  w2: (H_P, A)  b2: (1, A)
    tb, obs = x_ref.shape
    h_p = w1_ref.shape[1]

    x = x_ref[...]
    b1 = b1_ref[...].astype(jnp.float32)

    if obs <= 8:
        # Layer 1 on the VPU: `obs` broadcast-FMA accumulations over a
        # (TB, H_P) block. Avoids an MXU pass whose K dim would be almost all
        # zero padding and keeps x fully unpadded.
        h = jnp.broadcast_to(b1, (tb, h_p))
        for k in range(obs):  # static trip count, unrolled at trace time
            h = h + (x[:, k:k + 1].astype(jnp.float32)
                     * w1_ref[k:k + 1, :].astype(jnp.float32))
    else:
        h = jnp.dot(x, w1_ref[...], preferred_element_type=jnp.float32) + b1

    h = jnp.maximum(h, 0.0)  # ReLU

    # Second matmul on the MXU, f32 accumulation. Hidden activations are fed
    # in the weight dtype: no-op for f32 params, deliberate downcast only if
    # the caller stored bf16 params (MXU-native on v6e/v7x).
    out = jnp.dot(h.astype(w2_ref.dtype), w2_ref[...],
                  preferred_element_type=jnp.float32)
    out = out + b2_ref[...].astype(jnp.float32)
    o_ref[...] = out.astype(o_ref.dtype)


def prepare_params(w1, b1, w2, b2, dtype=None):
    """Pad the hidden dimension to a lane-dense multiple of 128 ONCE.

    This is hoisted out of the per-call forward path (the params don't change
    between calls). Zero padding keeps the math exact: padded hidden units get
    zero incoming weights/bias (relu(0)=0) and zero outgoing weights.
    Pass dtype=jnp.bfloat16 to store MXU-native params for large hidden sizes.
    """
    obs, H = w1.shape
    A = w2.shape[1]
    dt = dtype or w1.dtype
    H_P = _round_up(H, 128)

    w1p = jnp.zeros((obs, H_P), dt).at[:, :H].set(w1.astype(dt))
    b1p = jnp.zeros((1, H_P), dt).at[:, :H].set(jnp.reshape(b1, (1, H)).astype(dt))
    w2p = jnp.zeros((H_P, A), dt).at[:H, :].set(w2.astype(dt))
    b2p = jnp.reshape(b2, (1, A)).astype(dt)
    return w1p, b1p, w2p, b2p


def net_forward(x, params, *, tb=512):
    """Fused MLP forward. x: (B, obs); params from prepare_params()."""
    w1p, b1p, w2p, b2p = params
    B, obs = x.shape
    H_P = w1p.shape[1]
    A = w2p.shape[1]

    # ---- batch tiling ----
    B8 = _round_up(B, 8)
    cap = max(_round_up(tb, 8), 8)
    if B8 <= cap:
        TB = B8                       # one grid step for small batches
        steps = 1
    else:
        steps = _cdiv(B8, cap)
        if steps % 2:                 # even step count -> both v7x TCs get work
            steps += 1
        TB = _round_up(_cdiv(B8, steps), 8)
        steps = _cdiv(B8, TB)
    B_P = TB * steps

    # Only pad batch rows when needed (padded rows are sliced off below; they
    # evaluate to relu(b1)@w2+b2 which is discarded, so the result is exact).
    xp = x if B_P == B else jnp.zeros((B_P, obs), x.dtype).at[:B, :].set(x)

    out = pl.pallas_call(
        mlp_kernel,
        out_shape=jax.ShapeDtypeStruct((B_P, A), x.dtype),
        grid=(steps,),
        in_specs=[
            pl.BlockSpec((TB, obs), lambda i: (i, 0)),     # x: batch-tiled, obs unpadded
            # Constant index_map -> weights/biases stay VMEM-resident across
            # grid steps. For large H add pipeline_mode=pl.Buffered(1) here and
            # set vmem_limit_bytes in CompilerParams (v7x: 64 MiB physical).
            pl.BlockSpec((obs, H_P), lambda i: (0, 0)),    # w1
            pl.BlockSpec((1, H_P), lambda i: (0, 0)),      # b1
            pl.BlockSpec((H_P, A), lambda i: (0, 0)),      # w2
            pl.BlockSpec((1, A), lambda i: (0, 0)),        # b2
        ],
        # Output block last dim = A (full-dim block): no 128-lane padded
        # writeback and no post-kernel column slice.
        out_specs=pl.BlockSpec((TB, A), lambda i: (i, 0)),
        compiler_params=pltpu.CompilerParams(
            dimension_semantics=("parallel",),
        ),
    )(xp, w1p, b1p, w2p, b2p)

    return out if B_P == B else out[:B]


if __name__ == "__main__":
    # Small shapes consistent with the module (CartPole-style policy net).
    batch, obs_size, hidden_size, n_actions = 64, 4, 32, 2

    key = jax.random.PRNGKey(0)
    kx, k1, k2, k3, k4 = jax.random.split(key, 5)

    x = jax.random.normal(kx, (batch, obs_size), dtype=jnp.float32)
    # Deterministic PyTorch-like uniform init, stored as (in, out).
    w1 = jax.random.uniform(k1, (obs_size, hidden_size), dtype=jnp.float32,
                            minval=-1.0, maxval=1.0) / jnp.sqrt(obs_size)
    b1 = jax.random.uniform(k2, (1, hidden_size), dtype=jnp.float32,
                            minval=-1.0, maxval=1.0) / jnp.sqrt(obs_size)
    w2 = jax.random.uniform(k3, (hidden_size, n_actions), dtype=jnp.float32,
                            minval=-1.0, maxval=1.0) / jnp.sqrt(hidden_size)
    b2 = jax.random.uniform(k4, (1, n_actions), dtype=jnp.float32,
                            minval=-1.0, maxval=1.0) / jnp.sqrt(hidden_size)

    # Padding of the hidden dim happens once here, not per forward call.
    params = prepare_params(w1, b1, w2, b2)

    # B=64 -> single grid step (TB=64), no batch padding, no output slicing.
    out = net_forward(x, params)
    jax.block_until_ready(out)

    # Reference check in plain JAX.
    ref = jnp.maximum(x @ w1 + b1, 0.0) @ w2 + b2
    assert out.shape == (batch, n_actions)
    assert jnp.allclose(out, ref, atol=1e-5, rtol=1e-5)

    print("KERNEL_OK")
</pallas_src>

<mosaic_0001>
module attributes {stable_mosaic.version = 11 : i64} {
  func.func @mlp_kernel(%arg0: i32, %arg1: memref<64x4xf32, #tpu.memory_space<vmem>>, %arg2: memref<4x128xf32, #tpu.memory_space<vmem>>, %arg3: memref<1x128xf32, #tpu.memory_space<vmem>>, %arg4: memref<128x2xf32, #tpu.memory_space<vmem>>, %arg5: memref<1x2xf32, #tpu.memory_space<vmem>>, %arg6: memref<64x2xf32, #tpu.memory_space<vmem>>) attributes {dimension_semantics = [#tpu.dimension_semantics<parallel>], iteration_bounds = array<i64: 1>, scalar_prefetch = 0 : i64, scratch_operands = 0 : i64, tpu.core_type = #tpu.core_type<tc>, window_params = [{transform_indices = @transform_0, window_bounds = array<i64: 64, 4>}, {pipeline_mode = #tpu.pipeline_mode<synchronous>, transform_indices = @transform_1, window_bounds = array<i64: 4, 128>}, {pipeline_mode = #tpu.pipeline_mode<synchronous>, transform_indices = @transform_2, window_bounds = array<i64: 1, 128>}, {pipeline_mode = #tpu.pipeline_mode<synchronous>, transform_indices = @transform_3, window_bounds = array<i64: 128, 2>}, {pipeline_mode = #tpu.pipeline_mode<synchronous>, transform_indices = @transform_4, window_bounds = array<i64: 1, 2>}, {transform_indices = @transform_5, window_bounds = array<i64: 64, 2>}]} {
    %c0 = arith.constant 0 : index
    %c0_0 = arith.constant 0 : index
    %0 = vector.load %arg1[%c0, %c0_0] : memref<64x4xf32, #tpu.memory_space<vmem>>, vector<64x4xf32>
    %c0_1 = arith.constant 0 : index
    %c0_2 = arith.constant 0 : index
    %1 = vector.load %arg3[%c0_1, %c0_2] : memref<1x128xf32, #tpu.memory_space<vmem>>, vector<1x128xf32>
    %2 = vector.shape_cast %1 : vector<1x128xf32> to vector<1x128xf32>
    %3 = vector.broadcast %2 : vector<1x128xf32> to vector<64x128xf32>
    %4 = vector.extract_strided_slice %0 {offsets = [0, 0], sizes = [64, 1], strides = [1, 1]} : vector<64x4xf32> to vector<64x1xf32>
    %c0_3 = arith.constant 0 : index
    %c0_4 = arith.constant 0 : index
    %5 = vector.load %arg2[%c0_3, %c0_4] : memref<4x128xf32, #tpu.memory_space<vmem>>, vector<1x128xf32>
    %6 = vector.broadcast %4 : vector<64x1xf32> to vector<64x128xf32>
    %7 = vector.broadcast %5 : vector<1x128xf32> to vector<64x128xf32>
    %8 = arith.mulf %6, %7 : vector<64x128xf32>
    %9 = arith.addf %3, %8 : vector<64x128xf32>
    %10 = vector.extract_strided_slice %0 {offsets = [0, 1], sizes = [64, 1], strides = [1, 1]} : vector<64x4xf32> to vector<64x1xf32>
    %c1 = arith.constant 1 : index
    %c0_5 = arith.constant 0 : index
    %11 = vector.load %arg2[%c1, %c0_5] : memref<4x128xf32, #tpu.memory_space<vmem>>, vector<1x128xf32>
    %12 = vector.broadcast %10 : vector<64x1xf32> to vector<64x128xf32>
    %13 = vector.broadcast %11 : vector<1x128xf32> to vector<64x128xf32>
    %14 = arith.mulf %12, %13 : vector<64x128xf32>
    %15 = arith.addf %9, %14 : vector<64x128xf32>
    %16 = vector.extract_strided_slice %0 {offsets = [0, 2], sizes = [64, 1], strides = [1, 1]} : vector<64x4xf32> to vector<64x1xf32>
    %c2 = arith.constant 2 : index
    %c0_6 = arith.constant 0 : index
    %17 = vector.load %arg2[%c2, %c0_6] : memref<4x128xf32, #tpu.memory_space<vmem>>, vector<1x128xf32>
    %18 = vector.broadcast %16 : vector<64x1xf32> to vector<64x128xf32>
    %19 = vector.broadcast %17 : vector<1x128xf32> to vector<64x128xf32>
    %20 = arith.mulf %18, %19 : vector<64x128xf32>
    %21 = arith.addf %15, %20 : vector<64x128xf32>
    %22 = vector.extract_strided_slice %0 {offsets = [0, 3], sizes = [64, 1], strides = [1, 1]} : vector<64x4xf32> to vector<64x1xf32>
    %c3 = arith.constant 3 : index
    %c0_7 = arith.constant 0 : index
    %23 = vector.load %arg2[%c3, %c0_7] : memref<4x128xf32, #tpu.memory_space<vmem>>, vector<1x128xf32>
    %24 = vector.broadcast %22 : vector<64x1xf32> to vector<64x128xf32>
    %25 = vector.broadcast %23 : vector<1x128xf32> to vector<64x128xf32>
    %26 = arith.mulf %24, %25 : vector<64x128xf32>
    %27 = arith.addf %21, %26 : vector<64x128xf32>
    %cst = arith.constant 0.000000e+00 : f32
    %28 = vector.broadcast %cst : f32 to vector<64x128xf32>
    %29 = arith.maximumf %27, %28 : vector<64x128xf32>
    %c0_8 = arith.constant 0 : index
    %c0_9 = arith.constant 0 : index
    %30 = vector.load %arg4[%c0_8, %c0_9] : memref<128x2xf32, #tpu.memory_space<vmem>>, vector<128x2xf32>
    %cst_10 = arith.constant dense<0.000000e+00> : vector<64x2xf32>
    %31 = tpu.matmul %29, %30, %cst_10 {dimension_numbers = #tpu.dot_dimension_numbers<[1], [0], [0], [1], [0, 0, 1, 1], [], []>} : vector<64x128xf32>, vector<128x2xf32>, vector<64x2xf32> -> vector<64x2xf32>
    %c0_11 = arith.constant 0 : index
    %c0_12 = arith.constant 0 : index
    %32 = vector.load %arg5[%c0_11, %c0_12] : memref<1x2xf32, #tpu.memory_space<vmem>>, vector<1x2xf32>
    %33 = vector.broadcast %32 : vector<1x2xf32> to vector<64x2xf32>
    %34 = arith.addf %31, %33 : vector<64x2xf32>
    %c0_13 = arith.constant 0 : index
    %c0_14 = arith.constant 0 : index
    %35 = vector.load %arg6[%c0_13, %c0_14] : memref<64x2xf32, #tpu.memory_space<vmem>>, vector<64x2xf32>
    tpu.vector_store %arg6[%c0_13, %c0_14], %34 {strides = array<i32>} : memref<64x2xf32, #tpu.memory_space<vmem>>, vector<64x2xf32>,
    return
  }
  func.func @transform_0(%arg0: i32) -> (i32, i32) {
    %c0_i32 = arith.constant 0 : i32
    %c0_i32_0 = arith.constant 0 : i32
    return %arg0, %c0_i32 : i32, i32
  }
  func.func @transform_1(%arg0: i32) -> (i32, i32) {
    %c0_i32 = arith.constant 0 : i32
    %c0_i32_0 = arith.constant 0 : i32
    %c0_i32_1 = arith.constant 0 : i32
    return %c0_i32, %c0_i32_0 : i32, i32
  }
  func.func @transform_2(%arg0: i32) -> (i32, i32) {
    %c0_i32 = arith.constant 0 : i32
    %c0_i32_0 = arith.constant 0 : i32
    %c0_i32_1 = arith.constant 0 : i32
    return %c0_i32, %c0_i32_0 : i32, i32
  }
  func.func @transform_3(%arg0: i32) -> (i32, i32) {
    %c0_i32 = arith.constant 0 : i32
    %c0_i32_0 = arith.constant 0 : i32
    %c0_i32_1 = arith.constant 0 : i32
    return %c0_i32, %c0_i32_0 : i32, i32
  }
  func.func @transform_4(%arg0: i32) -> (i32, i32) {
    %c0_i32 = arith.constant 0 : i32
    %c0_i32_0 = arith.constant 0 : i32
    %c0_i32_1 = arith.constant 0 : i32
    return %c0_i32, %c0_i32_0 : i32, i32
  }
  func.func @transform_5(%arg0: i32) -> (i32, i32) {
    %c0_i32 = arith.constant 0 : i32
    %c0_i32_0 = arith.constant 0 : i32
    return %arg0, %c0_i32 : i32, i32
  }
}

</mosaic_0001>

<bundles_post_ra>
// kernel: tpu_custom_call.1
= control target key start
LH: loop header
LB: loop body
LE: loop exit
PB: predicated region body
PF: predicated region fallthrough
CT: control target
= control target key end

     0   :  { %v530_v0 = vmov 0   ;;  %v531_v6 = vmov 1   ;;  %v532_v12 = vmov 2   ;;  %v533_v23 = vmov 3   ;;  %s810_s0 = inlined_call_operand.vmem [shape: f32[64,4], index: 0, kind: input, shape index: {}]   ;;  %s811_s3 = inlined_call_operand.vmem [shape: f32[128,2], index: 3, kind: input, shape index: {}]   ;;  %s812_s1 = inlined_call_operand.vmem [shape: f32[4,128], index: 1, kind: input, shape index: {}]   ;;  %s813_s2 = inlined_call_operand.vmem [shape: f32[1,128], index: 2, kind: input, shape index: {}]   ;;  %s814_s4 = inlined_call_operand.vmem [shape: f32[1,2], index: 4, kind: input, shape index: {}]   ;;  %s815_s5 = inlined_call_operand.vmem [shape: f32[64,2], index: 5, kind: output, shape index: {}]  }
   0x1   :  { %515 = vset.pattern.permute.xlu1 %v530_v0  ;;  %514 = vset.pattern.permute.xlu0 %v530_v0  ;;  %v567_v1 = vld [vmem:[%s810_s0 + $0x8] sm:$0xff]  ;;  %v572_v2 = vld [vmem:[%s810_s0] sm:$0xff]  ;;  %v591_v5 = vld [vmem:[%s810_s0 + $0x30] sm:$0xff]  ;;  %vm391_vm0 = vcmask 15360  }
   0x2   :  { %43 = vperm.xlu1 %515, %v567_v1   ;;  %38 = vperm.xlu0 %514, %v572_v2   ;;  %v579_v3 = vld [vmem:[%s810_s0 + $0x28] sm:$0xff]  ;;  %v584_v4 = vld [vmem:[%s810_s0 + $0x20] sm:$0xff]  ;;  %v599_v7 = vld [vmem:[%s810_s0 + $0x18] sm:$0xff] }
   0x3   :  { %v606_v8 = vld [vmem:[%s810_s0 + $0x10] sm:$0xff]  ;;  %v278_v9 = vld [vmem:[%s811_s3 + $0x78] sm:$0xff]  ;;  %v276_v11 = vld [vmem:[%s811_s3 + $0x68] sm:$0xff] }
   0x4   :  { %434 = vmatprep.subr.mxu0 %v278_v9  ;;  %v277_v10 = vld [vmem:[%s811_s3 + $0x70] sm:$0xff]  ;;  %478 = vmatprep.subr.mxu1 %v278_v9  ;;  %v275_v13 = vld [vmem:[%s811_s3 + $0x60] sm:$0xff]  ;;  %v274_v14 = vld [vmem:[%s811_s3 + $0x58] sm:$0xff] }
   0x5   :  { %435 = vmatpush3.msra.mxu0 %v278_v9  ;;  %494 = vmatpush3.msra.mxu1 %v278_v9  ;;  %v273_v15 = vld [vmem:[%s811_s3 + $0x50] sm:$0xff]  ;;  %v638_v16 = vld [vmem:[%s810_s0 + $0x38] sm:$0xff]  ;;  %v272_v17 = vld [vmem:[%s811_s3 + $0x48] sm:$0xff] }
   0x6   :  { %63 = vperm.xlu1 %515, %v579_v3   ;;  %58 = vperm.xlu0 %514, %v584_v4   ;;  %v271_v18 = vld [vmem:[%s811_s3 + $0x40] sm:$0xff]  ;;  %v270_v19 = vld [vmem:[%s811_s3 + $0x38] sm:$0xff]  ;;  %v269_v20 = vld [vmem:[%s811_s3 + $0x30] sm:$0xff] }
   0x7   :  { %436 = vmatprep.subr.mxu0 %v277_v10  ;;  %479 = vmatprep.subr.mxu1 %v277_v10  ;;  %v268_v21 = vld [vmem:[%s811_s3 + $0x28] sm:$0xff]  ;;  %v267_v22 = vld [vmem:[%s811_s3 + $0x20] sm:$0xff]  ;;  %v266_v24 = vld [vmem:[%s811_s3 + $0x18] sm:$0xff] }
   0x8   :  { %437 = vmatpush3.msra.mxu0 %v277_v10  ;;  %495 = vmatpush3.msra.mxu1 %v277_v10  ;;  %v265_v25 = vld [vmem:[%s811_s3 + $0x10] sm:$0xff]  ;;  %v264_v26 = vld [vmem:[%s811_s3 + $0x8] sm:$0xff]  ;;  %v263_v27 = vld [vmem:[%s811_s3] sm:$0xff] }
   0x9   :  { %438 = vmatprep.subr.mxu0 %v276_v11  ;;  %480 = vmatprep.subr.mxu1 %v276_v11  ;;  %v705_v45 = vld [vmem:[%s812_s1] ss:$0 sm:$0xff]  ;;  %v719_v51 = vld [vmem:[%s812_s1 + $0x1] ss:$0 sm:$0xff]  ;;  %v727_v55 = vld [vmem:[%s812_s1 + $0x2] ss:$0 sm:$0xff] }
   0xa   :  { %516 = vset.pattern.permute.xlu1 %v531_v6  ;;  %68 = vperm.xlu0 %514, %v591_v5   ;;  %v713_v49 = vld [vmem:[%s813_s2] ss:$0 sm:$0xff]  ;;  %v733_v58 = vld [vmem:[%s812_s1 + $0x3] ss:$0 sm:$0xff] }
   0xb   :  { %114 = vperm.xlu1 %516, %v584_v4   ;;  %439 = vmatpush3.msra.mxu0 %v276_v11 }
   0xc   :  { %440 = vmatprep.subr.mxu0 %v275_v13  ;;  %496 = vmatpush3.msra.mxu1 %v276_v11 }
   0xd   :  { %441 = vmatpush3.msra.mxu0 %v275_v13  ;;  %481 = vmatprep.subr.mxu1 %v275_v13 }
   0xe   :  { %53 = vperm.xlu0 %514, %v599_v7   ;;  %442 = vmatprep.subr.mxu0 %v274_v14 }
   0xf   :  { %102 = vperm.xlu1 %516, %v567_v1   ;;  %443 = vmatpush3.msra.mxu0 %v274_v14 }
  0x10   :  { %444 = vmatprep.subr.mxu0 %v273_v15  ;;  %497 = vmatpush3.msra.mxu1 %v275_v13 }
  0x11   :  { %445 = vmatpush3.msra.mxu0 %v273_v15  ;;  %482 = vmatprep.subr.mxu1 %v274_v14 }
  0x12   :  { %519 = vset.pattern.permute.xlu0 %v531_v6  ;;  %446 = vmatprep.subr.mxu0 %v272_v17 }
  0x13   :  { %517 = vset.pattern.permute.xlu1 %v530_v0  ;;  %98 = vperm.xlu0 %519, %v572_v2  }
  0x14   :  { %48 = vperm.xlu1 %517, %v606_v8   ;;  %447 = vmatpush3.msra.mxu0 %v272_v17 }
  0x15   :  { %448 = vmatprep.subr.mxu0 %v271_v18  ;;  %498 = vmatpush3.msra.mxu1 %v274_v14 }
  0x16   :  { %449 = vmatpush3.msra.mxu0 %v271_v18  ;;  %483 = vmatprep.subr.mxu1 %v273_v15 }
  0x17   :  { %118 = vperm.xlu0 %519, %v579_v3   ;;  %450 = vmatprep.subr.mxu0 %v270_v19 }
  0x18   :  { %518 = vset.pattern.permute.xlu1 %v532_v12  ;;  %451 = vmatpush3.msra.mxu0 %v270_v19 }
  0x19   :  { %151 = vperm.xlu1 %518, %v572_v2   ;;  %452 = vmatprep.subr.mxu0 %v269_v20 }
  0x1a   :  { %453 = vmatpush3.msra.mxu0 %v269_v20  ;;  %499 = vmatpush3.msra.mxu1 %v273_v15 }
  0x1b   :  { %122 = vperm.xlu0 %519, %v591_v5   ;;  %454 = vmatprep.subr.mxu0 %v268_v21 }
  0x1c   :  { %455 = vmatpush3.msra.mxu0 %v268_v21  ;;  %484 = vmatprep.subr.mxu1 %v272_v17 }
  0x1d   :  { %167 = vperm.xlu1 %518, %v584_v4   ;;  %456 = vmatprep.subr.mxu0 %v267_v22 }
  0x1e   :  { %457 = vmatpush3.msra.mxu0 %v267_v22  ;;  %500 = vmatpush3.msra.mxu1 %v272_v17 }
  0x1f   :  { %110 = vperm.xlu0 %519, %v599_v7   ;;  %458 = vmatprep.subr.mxu0 %v266_v24 }
  0x20   :  { %459 = vmatpush3.msra.mxu0 %v266_v24  ;;  %485 = vmatprep.subr.mxu1 %v271_v18 }
  0x21   :  { %520 = vset.pattern.permute.xlu1 %v530_v0  ;;  %460 = vmatprep.subr.mxu0 %v265_v25 }
  0x22   :  { %73 = vperm.xlu1 %520, %v638_v16   ;;  %461 = vmatpush3.msra.mxu0 %v265_v25 }
  0x23   :  { %524 = vset.pattern.permute.xlu0 %v532_v12  ;;  %501 = vmatpush3.msra.mxu1 %v271_v18 }
  0x24   :  { %155 = vperm.xlu0 %524, %v567_v1   ;;  %462 = vmatprep.subr.mxu0 %v264_v26 }
  0x25   :  { %486 = vmatprep.subr.mxu1 %v270_v19  ;;  %463 = vmatpush3.msra.mxu0 %v264_v26 }
  0x26   :  { %521 = vset.pattern.permute.xlu1 %v532_v12  ;;  %502 = vmatpush3.msra.mxu1 %v270_v19 }
  0x27   :  { %171 = vperm.xlu1 %521, %v579_v3   ;;  %464 = vmatprep.subr.mxu0 %v263_v27 }
  0x28   :  { %175 = vperm.xlu0 %524, %v591_v5   ;;  %487 = vmatprep.subr.mxu1 %v269_v20 }
  0x29   :  { %465 = vmatpush3.msra.mxu0 %v263_v27  ;;  %503 = vmatpush3.msra.mxu1 %v269_v20 }
  0x2a   :  { %488 = vmatprep.subr.mxu1 %v268_v21 }
  0x2b   :  { %522 = vset.pattern.permute.xlu1 %v531_v6  ;;  %504 = vmatpush3.msra.mxu1 %v268_v21 }
  0x2c   :  { %106 = vperm.xlu1 %522, %v606_v8   ;;  %528 = vset.pattern.permute.xlu0 %v533_v23 }
  0x2d   :  { %208 = vperm.xlu0 %528, %v567_v1   ;;  %489 = vmatprep.subr.mxu1 %v267_v22 }
  0x2e   :  { %505 = vmatpush3.msra.mxu1 %v267_v22 }
  0x2f   :  { %490 = vmatprep.subr.mxu1 %v266_v24 }
  0x30   :  { %523 = vset.pattern.permute.xlu1 %v533_v23  ;;  %506 = vmatpush3.msra.mxu1 %v266_v24 }
  0x31   :  { %204 = vperm.xlu1 %523, %v572_v2   ;;  %212 = vperm.xlu0 %528, %v606_v8  }
  0x32   :  { %491 = vmatprep.subr.mxu1 %v265_v25 }
  0x33   :  { %507 = vmatpush3.msra.mxu1 %v265_v25 }
  0x34   :  { %492 = vmatprep.subr.mxu1 %v264_v26 }
  0x35   :  { %220 = vperm.xlu1 %523, %v584_v4   ;;  %232 = vperm.xlu0 %528, %v638_v16  }
  0x36   :  { %508 = vmatpush3.msra.mxu1 %v264_v26 }
  0x37   :  { %493 = vmatprep.subr.mxu1 %v263_v27 }
  0x38   :  { %509 = vmatpush3.msra.mxu1 %v263_v27 }
  0x39   :  { %525 = vset.pattern.permute.xlu1 %v531_v6 }
  0x3a   :  { %126 = vperm.xlu1 %525, %v638_v16  }
  0x3e   :  { %526 = vset.pattern.permute.xlu1 %v533_v23 }
  0x3f   :  { %224 = vperm.xlu1 %526, %v579_v3  }
  0x43   :  { %527 = vset.pattern.permute.xlu1 %v532_v12 }
  0x44   :  { %159 = vperm.xlu1 %527, %v606_v8  }
  0x48   :  { %163 = vperm.xlu1 %527, %v599_v7  }
  0x4c   :  { %179 = vperm.xlu1 %527, %v638_v16  }
  0x50   :  { %529 = vset.pattern.permute.xlu1 %v533_v23 }
  0x51   :  { %228 = vperm.xlu1 %529, %v591_v5  }
  0x55   :  { %216 = vperm.xlu1 %529, %v599_v7  }
  0x7d   :  { %v44_v28 = vpop.permute.xlu1 %43  ;;  %v39_v29 = vpop.permute.xlu0 %38 }
  0x7e   :  { %v80_v46 = vmul.f32 %v705_v45, %v39_v29  ;;  %v81_v50 = vmul.f32 %v705_v45, %v44_v28 }
  0x80   :  { %v88_v52 = vadd.f32 %v713_v49, %v80_v46  ;;  %v89_v59 = vadd.f32 %v713_v49, %v81_v50 }
  0x81   :  { %v64_v30 = vpop.permute.xlu1 %63  ;;  %v59_v31 = vpop.permute.xlu0 %58 }
  0x82   :  { %v84_v56 = vmul.f32 %v705_v45, %v59_v31  ;;  %v85_v17 = vmul.f32 %v705_v45, %v64_v30 }
  0x84   :  { %v92_v2 = vadd.f32 %v713_v49, %v84_v56  ;;  %v93_v22 = vadd.f32 %v713_v49, %v85_v17 }
  0x85   :  { %v692_v32 = vpop.permute.xlu0 %68 }
  0x86   :  { %v115_v33 = vpop.permute.xlu1 %114  ;;  %v86_v46 = vmul.f32 %v705_v45, %v692_v32 }
  0x87   :  { %v137_v3 = vmul.f32 %v719_v51, %v115_v33 }
  0x88   :  { %v94_v56 = vadd.f32 %v713_v49, %v86_v46 }
  0x89   :  { %v694_v34 = vpop.permute.xlu0 %53  ;;  %v145_v10 = vadd.f32 %v137_v3, %v92_v2 }
  0x8a   :  { %v103_v35 = vpop.permute.xlu1 %102 }
  0x8b   :  { %v134_v54 = vmul.f32 %v719_v51, %v103_v35 }
  0x8d   :  { %v142_v0 = vadd.f32 %v134_v54, %v89_v59 }
  0x8e   :  { %v99_v36 = vpop.permute.xlu0 %98 }
  0x8f   :  { %v49_v37 = vpop.permute.xlu1 %48  ;;  %v133_v53 = vmul.f32 %v719_v51, %v99_v36 }
  0x90   :  { %v82_v25 = vmul.f32 %v705_v45, %v49_v37 }
  0x91   :  { %v141_v62 = vadd.f32 %v133_v53, %v88_v52 }
  0x92   :  { %v119_v38 = vpop.permute.xlu0 %118  ;;  %v90_v33 = vadd.f32 %v713_v49, %v82_v25 }
  0x93   :  { %v138_v19 = vmul.f32 %v719_v51, %v119_v38 }
  0x94   :  { %v152_v39 = vpop.permute.xlu1 %151 }
  0x95   :  { %v186_v63 = vmul.f32 %v727_v55, %v152_v39  ;;  %v146_v24 = vadd.f32 %v138_v19, %v93_v22 }
  0x96   :  { %v696_v40 = vpop.permute.xlu0 %122 }
  0x97   :  { %v194_v8 = vadd.f32 %v186_v63, %v141_v62  ;;  %v139_v59 = vmul.f32 %v719_v51, %v696_v40 }
  0x98   :  { %v168_v41 = vpop.permute.xlu1 %167 }
  0x99   :  { %v190_v6 = vmul.f32 %v727_v55, %v168_v41  ;;  %v147_v2 = vadd.f32 %v139_v59, %v94_v56 }
  0x9a   :  { %v698_v42 = vpop.permute.xlu0 %110 }
  0x9b   :  { %v198_v15 = vadd.f32 %v190_v6, %v145_v10 }
  0x9d   :  { %v700_v43 = vpop.permute.xlu1 %73 }
  0x9e   :  { %v87_v37 = vmul.f32 %v705_v45, %v700_v43 }
  0x9f   :  { %v156_v44 = vpop.permute.xlu0 %155 }
  0xa0   :  { %v187_v60 = vmul.f32 %v727_v55, %v156_v44  ;;  %v95_v53 = vadd.f32 %v713_v49, %v87_v37 }
  0xa2   :  { %v172_v47 = vpop.permute.xlu1 %171  ;;  %v195_v4 = vadd.f32 %v187_v60, %v142_v0 }
  0xa3   :  { %v708_v48 = vpop.permute.xlu0 %175  ;;  %v191_v23 = vmul.f32 %v727_v55, %v172_v47 }
  0xa4   :  { %v192_v62 = vmul.f32 %v727_v55, %v708_v48 }
  0xa5   :  { %v199_v27 = vadd.f32 %v191_v23, %v146_v24 }
  0xa6   :  { %v200_v40 = vadd.f32 %v192_v62, %v147_v2 }
  0xa7   :  { %v107_v57 = vpop.permute.xlu1 %106 }
  0xa8   :  { %v209_v61 = vpop.permute.xlu0 %208  ;;  %v135_v29 = vmul.f32 %v719_v51, %v107_v57  ;;  %v83_v57 = vmul.f32 %v705_v45, %v694_v34  ;;  %v136_v34 = vmul.f32 %v719_v51, %v698_v42  ;;  %v409_v42 = vld [vmem:[%s814_s4] ss:$0 sm:$0xff] }
  0xa9   :  { %v240_v1 = vmul.f32 %v733_v58, %v209_v61 }
  0xaa   :  { %v143_v38 = vadd.f32 %v135_v29, %v90_v33 }
  0xab   :  { %v248_v9 = vadd.f32 %v240_v1, %v195_v4  ;;  %v91_v1 = vadd.f32 %v713_v49, %v83_v57 }
  0xac   :  { %v205_v5 = vpop.permute.xlu1 %204  ;;  %v213_v31 = vpop.permute.xlu0 %212 }
  0xad   :  { %v239_v7 = vmul.f32 %v733_v58, %v205_v5  ;;  %v256_v16 = vmax.f32 %v248_v9, 0.0  ;;  %v241_v41 = vmul.f32 %v733_v58, %v213_v31  ;;  %v144_v6 = vadd.f32 %v136_v34, %v91_v1 }
  0xaf   :  { %v247_v11 = vadd.f32 %v239_v7, %v194_v8 }
  0xb0   :  { %v221_v12 = vpop.permute.xlu1 %220  ;;  %v233_v60 = vpop.permute.xlu0 %232 }
  0xb1   :  { %v243_v13 = vmul.f32 %v733_v58, %v221_v12  ;;  %v255_v14 = vmax.f32 %v247_v11, 0.0  ;;  %v246_v0 = vmul.f32 %v733_v58, %v233_v60 }
  0xb3   :  { %466 = vmatprep.mubr.f32.mxu0 %v255_v14  ;;  %v251_v18 = vadd.f32 %v243_v13, %v198_v15 }
  0xb4   :  { %467 = vmatmul.mubr.f32.vlgmr.msra.gmra.mxu0 %v256_v16 }
  0xb5   :  { %v127_v20 = vpop.permute.xlu1 %126  ;;  %v259_v21 = vmax.f32 %v251_v18, 0.0 }
  0xb6   :  { %v140_v50 = vmul.f32 %v719_v51, %v127_v20 }
  0xb7   :  { %472 = vmatprep.mubr.f32.mxu1 %v259_v21 }
  0xb8   :  { %v148_v61 = vadd.f32 %v140_v50, %v95_v53 }
  0xba   :  { %v225_v26 = vpop.permute.xlu1 %224 }
  0xbb   :  { %v244_v28 = vmul.f32 %v733_v58, %v225_v26 }
  0xbd   :  { %v252_v30 = vadd.f32 %v244_v28, %v199_v27 }
  0xbf   :  { %v260_v35 = vmax.f32 %v252_v30, 0.0  ;;  %v160_v36 = vpop.permute.xlu1 %159 }
  0xc0   :  { %v188_v39 = vmul.f32 %v727_v55, %v160_v36 }
  0xc1   :  { %473 = vmatmul.mubr.f32.vlgmr.msra.gmra.mxu1 %v260_v35 }
  0xc2   :  { %v196_v44 = vadd.f32 %v188_v39, %v143_v38 }
  0xc3   :  { %v164_v47 = vpop.permute.xlu1 %163 }
  0xc4   :  { %v249_v52 = vadd.f32 %v241_v41, %v196_v44  ;;  %v189_v3 = vmul.f32 %v727_v55, %v164_v47 }
  0xc6   :  { %v257_v54 = vmax.f32 %v249_v52, 0.0  ;;  %v197_v48 = vadd.f32 %v189_v3, %v144_v6 }
  0xc7   :  { %v180_v43 = vpop.permute.xlu1 %179 }
  0xc8   :  { %v193_v32 = vmul.f32 %v727_v55, %v180_v43  ;;  %469 = vmatprep.mubr.f32.mxu0 %v257_v54 }
  0xca   :  { %v201_v63 = vadd.f32 %v193_v32, %v148_v61 }
  0xcc   :  { %v229_v45 = vpop.permute.xlu1 %228  ;;  %v254_v5 = vadd.f32 %v246_v0, %v201_v63 }
  0xcd   :  { %v245_v4 = vmul.f32 %v733_v58, %v229_v45 }
  0xce   :  { %v262_v11 = vmax.f32 %v254_v5, 0.0 }
  0xcf   :  { %v253_v7 = vadd.f32 %v245_v4, %v200_v40 }
  0xd0   :  { %v217_v8 = vpop.permute.xlu1 %216 }
  0xd1   :  { %v261_v9 = vmax.f32 %v253_v7, 0.0  ;;  %v242_v10 = vmul.f32 %v733_v58, %v217_v8 }
  0xd3   :  { %v250_v49 = vadd.f32 %v242_v10, %v197_v48  ;;  %475 = vmatprep.mubr.f32.mxu1 %v261_v9 }
  0xd4   :  { %476 = vmatmul.mubr.f32.gmra.mxu1 %v262_v11 }
  0xd5   :  { %v258_v12 = vmax.f32 %v250_v49, 0.0 }
  0xd7   :  { %470 = vmatmul.mubr.f32.gmra.mxu0 %v258_v12 }
 0x174   :  { %v468_v51 = vpop.f32.mrf.mxu0 }
 0x175   :  { %v358_v55 = vadd.f32 %v468_v51, %v409_v42 }
 0x176   :  { %v352_v13 = vpop.f32.mrf.mxu0 }
 0x177   :  { %393 = vst.msk [vmem:[%s815_s5 + $0x8] sm:$0xff] %vm391_vm0, %v358_v55  ;;  %v353_v58 = vadd.f32 %v409_v42, %v352_v13 }
 0x179   :  { %392 = vst.msk [vmem:[%s815_s5] sm:$0xff] %vm391_vm0, %v353_v58 }
 0x181   :  { %v474_v14 = vpop.f32.mrf.mxu1 }
 0x182   :  { %v378_v15 = vadd.f32 %v474_v14, %v409_v42 }
 0x183   :  { %v372_v16 = vpop.f32.mrf.mxu1 }
 0x184   :  { %397 = vst.msk [vmem:[%s815_s5 + $0x28] sm:$0xff] %vm391_vm0, %v378_v15  ;;  %v373_v17 = vadd.f32 %v409_v42, %v372_v16 }
 0x186   :  { %396 = vst.msk [vmem:[%s815_s5 + $0x20] sm:$0xff] %vm391_vm0, %v373_v17 }
 0x194   :  { %v477_v18 = vpop.f32.mrf.mxu1 }
 0x195   :  { %v388_v19 = vadd.f32 %v477_v18, %v409_v42 }
 0x196   :  { %v382_v20 = vpop.f32.mrf.mxu1 }
 0x197   :  { %399 = vst.msk [vmem:[%s815_s5 + $0x38] sm:$0xff] %vm391_vm0, %v388_v19  ;;  %v383_v21 = vadd.f32 %v409_v42, %v382_v20  ;;  %v471_v22 = vpop.f32.mrf.mxu0 }
 0x198   :  { %v368_v23 = vadd.f32 %v471_v22, %v409_v42 }
 0x199   :  { %398 = vst.msk [vmem:[%s815_s5 + $0x30] sm:$0xff] %vm391_vm0, %v383_v21  ;;  %v362_v24 = vpop.f32.mrf.mxu0 }
 0x19a   :  { %395 = vst.msk [vmem:[%s815_s5 + $0x18] sm:$0xff] %vm391_vm0, %v368_v23  ;;  %v363_v25 = vadd.f32 %v409_v42, %v362_v24 }
 0x19c   :  { %394 = vst.msk [vmem:[%s815_s5 + $0x10] sm:$0xff] %vm391_vm0, %v363_v25 }

</bundles_post_ra>
